<compile_context>
chip_gen: v6e
topology: v6e:2x2x1
jax: 0.10.0
libtpu: 0.0.40
codegen_flags: <defaults>
</compile_context>

<pallas_src>
import functools

import jax
import jax.numpy as jnp
from jax.experimental import pallas as pl
from jax.experimental.pallas import tpu as pltpu


def _round_up(x, m):
    return ((x + m - 1) // m) * m


def _vmem_capacity_bytes(default=64 * 1024 * 1024):
    """Physical VMEM of the current generation (v5e/v6e 128 MiB, v7x 64 MiB)."""
    try:
        cap = getattr(pltpu.get_tpu_info(), "vmem_capacity_bytes", None)
        return int(cap) if cap else default
    except Exception:
        return default


def _skip_conv1d_kernel(xm_ref, xh_ref, w_ref, b_ref, o_ref, *, K, TM, crop0, mxu_dtype):
    """One (batch n, out-channel block m, time tile t) grid step.

    xm_ref: (C_pad, TT)    f32 activations, input cols [t*TT, t*TT + TT)
    xh_ref: (C_pad, 128)   f32 halo tile,   input cols [t*TT + TT, t*TT + TT + 128)
    w_ref : (K, TM, C_pad) mxu_dtype conv weights (tap, out-ch, in-ch)
    b_ref : (TM, 1)        f32 bias
    o_ref : (TM, TT)       output tile = conv + bias + skip for out cols [t*TT, t*TT+TT)
    """
    TT = o_ref.shape[-1]
    C_pad = xm_ref.shape[0]

    # Halo'd window built once in VMEM; taps are lane-shifted slices of it.
    full_f32 = jnp.concatenate([xm_ref[...], xh_ref[...]], axis=-1)   # (C_pad, TT+128)
    full_mxu = full_f32.astype(mxu_dtype)                             # no-op if f32

    acc = None
    for k in range(K):                                   # static unroll, K is tiny
        tap = full_mxu[:, k:k + TT]                      # (C_pad, TT) lane shift (XLU)
        d = jnp.dot(w_ref[k], tap, preferred_element_type=jnp.float32)
        acc = d if acc is None else acc + d              # (TM, TT) f32 accumulate

    # Exact f32 residual: rows of the input matching this out-channel block,
    # columns shifted by crop0 (reuses the already-loaded halo'd window).
    skip_full = full_f32[:, crop0:crop0 + TT]            # (C_pad, TT) f32
    if TM == C_pad:
        skip = skip_full
    else:
        m = pl.program_id(1)
        skip = jax.lax.dynamic_slice_in_dim(skip_full, m * TM, TM, axis=0)

    o_ref[...] = (acc + (skip + b_ref[...])).astype(o_ref.dtype)


def skip_conv1d(x, weight, bias, crop=(1, 1), *, mxu_dtype=jnp.bfloat16, time_tile=None):
    """out = x[..., crop0:T-crop1] + conv1d_valid(x, weight, bias).

    x:      (N, C, T)  float32 (NCT, PyTorch Conv1d convention)
    weight: (C, C, K)  float32 (PyTorch Conv1d weight layout: O, I, K)
    bias:   (C,)       float32
    mxu_dtype: dtype of the matmul operands (default bf16).  The skip/residual,
               bias and accumulation are always exact f32, so only the conv term
               is rounded.  Pass None (or jnp.float32) for a fully exact path.
    """
    N, C_in, T = x.shape
    C_out, C_in_w, K = weight.shape
    assert C_in_w == C_in
    assert C_out == C_in, "skip add requires matching channel counts"
    c0, c1 = crop
    assert K == c0 + c1 + 1, "crop must match the conv receptive field"
    assert K - 1 <= 128, "halo tile covers at most 128 extra columns"
    T_out = T - (K - 1)
    assert T_out > 0

    orig_dtype = x.dtype
    mxu_dtype = orig_dtype if mxu_dtype is None else mxu_dtype

    # -------- out-channel blocking (keeps the weight block inside VMEM) --------
    if C_out <= 256:
        TM = _round_up(C_out, 8)
        C_pad = TM
    else:
        TM = 256
        C_pad = _round_up(C_out, TM)
    num_m = C_pad // TM

    # -------- lane-tile sizing from the VMEM budget (generation aware) --------
    in_b = jnp.dtype(mxu_dtype).itemsize
    out_b = jnp.dtype(orig_dtype).itemsize
    vmem_cap = _vmem_capacity_bytes()
    if time_tile is None:
        budget = (2 * vmem_cap) // 5                      # ~40% of VMEM for working set
        # bytes per lane column: main x tile (f32, double-buffered) + in-kernel
        # halo'd window (f32 + mxu copy + K tap slices) + f32 accumulator +
        # output tile (double-buffered).
        per_col = (2 * C_pad * 4) + (C_pad * 4) + (C_pad * in_b) \
                  + (K * C_pad * in_b) + (TM * 4) + (2 * TM * out_b)
        # fixed: double-buffered weight block + halo tiles + bias.
        fixed = 2 * K * TM * C_pad * in_b + 2 * C_pad * 128 * 4 + 2 * TM * 4
        tt = max(256, ((max(budget - fixed, 0) // max(per_col, 1)) // 256) * 256)
    else:
        tt = _round_up(time_tile, 128)
    TT = min(tt, _round_up(T_out, 128))
    num_t = pl.cdiv(T_out, TT)

    # v7x has 2 TensorCores: make sure the (all-parallel) grid has >= 2 steps.
    if N * num_m * num_t < 2 and T_out > 128:
        TT = _round_up(-(-T_out // 2), 128)
        num_t = pl.cdiv(T_out, TT)

    T_span = num_t * TT                # padded, lane-dense output time extent
    T_in_pad = T_span + 128            # + one 128-lane halo block at the tail

    # -------- layout plumbing: single pad of the RAW input (no HBM im2col) ----
    x_p = jnp.pad(x, ((0, 0), (0, C_pad - C_in), (0, T_in_pad - T)))
    w3 = jnp.transpose(weight, (2, 0, 1))                               # (K, O, I)
    w3 = jnp.pad(w3, ((0, 0), (0, C_pad - C_out), (0, C_pad - C_in))).astype(mxu_dtype)
    b2 = jnp.pad(bias, (0, C_pad - C_out)).reshape(C_pad, 1).astype(jnp.float32)

    kernel = functools.partial(_skip_conv1d_kernel,
                               K=K, TM=TM, crop0=c0, mxu_dtype=mxu_dtype)
    tt_blocks = TT // 128              # halo tile index stride (in 128-lane blocks)

    out_p = pl.pallas_call(
        kernel,
        out_shape=jax.ShapeDtypeStruct((N, C_pad, T_span), orig_dtype),
        grid=(N, num_m, num_t),
        in_specs=[
            # main activation tile
            pl.BlockSpec((None, C_pad, TT), lambda n, m, t: (n, 0, t)),
            # 128-lane halo tile over the SAME array (next 128 input columns)
            pl.BlockSpec((None, C_pad, 128),
                         lambda n, m, t: (n, 0, (t + 1) * tt_blocks)),
            # conv weights (per-tap matrices), constant over n/t
            pl.BlockSpec((K, TM, C_pad), lambda n, m, t: (0, m, 0)),
            # bias
            pl.BlockSpec((TM, 1), lambda n, m, t: (m, 0)),
        ],
        out_specs=pl.BlockSpec((None, TM, TT), lambda n, m, t: (n, m, t)),
        compiler_params=pltpu.CompilerParams(
            dimension_semantics=("parallel", "parallel", "parallel"),
            vmem_limit_bytes=min((3 * vmem_cap) // 4, 112 * 1024 * 1024),
        ),
    )(x_p, x_p, w3, b2)

    # -------- undo padding --------
    return out_p[:, :C_out, :T_out]


def _reference(x, weight, bias, crop=(1, 1)):
    # Pure-JAX reference: valid Conv1d (NCT) + cropped skip.
    out = jax.lax.conv_general_dilated(
        x, weight, window_strides=(1,), padding="VALID",
        dimension_numbers=("NCH", "OIH", "NCH"))
    out = out + bias[None, :, None]
    end = x.shape[-1] - crop[1] if crop[1] > 0 else None
    return x[..., crop[0]:end] + out


if __name__ == "__main__":
    key = jax.random.PRNGKey(0)
    k_x, k_w, k_b = jax.random.split(key, 3)

    N, C, T, K = 2, 4, 16, 3          # small 3D input (batch, channels, time)
    crop = (1, 1)

    x = jax.random.normal(k_x, (N, C, T), dtype=jnp.float32)
    weight = jax.random.normal(k_w, (C, C, K), dtype=jnp.float32) * 0.1
    bias = jax.random.normal(k_b, (C,), dtype=jnp.float32) * 0.1

    ref = _reference(x, weight, bias, crop=crop)

    # Exact f32 MXU path (matches the f32 reference tightly).
    out_f32 = jax.block_until_ready(skip_conv1d(x, weight, bias, crop=crop, mxu_dtype=None))
    assert out_f32.shape == (N, C, T - crop[0] - crop[1])
    assert jnp.allclose(out_f32, ref, atol=1e-4, rtol=1e-4)

    # Default fast path: bf16 MXU operands, exact f32 residual + bias.
    out_bf16 = jax.block_until_ready(skip_conv1d(x, weight, bias, crop=crop))
    assert out_bf16.shape == out_f32.shape
    assert jnp.allclose(out_bf16, ref, atol=5e-2, rtol=5e-2)

    print("KERNEL_OK")
</pallas_src>

<mosaic_0001>
module attributes {stable_mosaic.version = 11 : i64} {
  func.func @_skip_conv1d_kernel(%arg0: i32, %arg1: i32, %arg2: i32, %arg3: memref<1x8x128xf32, #tpu.memory_space<vmem>>, %arg4: memref<1x8x128xf32, #tpu.memory_space<vmem>>, %arg5: memref<3x8x8xf32, #tpu.memory_space<vmem>>, %arg6: memref<8x1xf32, #tpu.memory_space<vmem>>, %arg7: memref<1x8x128xf32, #tpu.memory_space<vmem>>) attributes {dimension_semantics = [#tpu.dimension_semantics<parallel>, #tpu.dimension_semantics<parallel>, #tpu.dimension_semantics<parallel>], iteration_bounds = array<i64: 2, 1, 1>, scalar_prefetch = 0 : i64, scratch_operands = 0 : i64, tpu.core_type = #tpu.core_type<tc>, window_params = [{transform_indices = @transform_0, window_bounds = array<i64: 1, 8, 128>}, {transform_indices = @transform_1, window_bounds = array<i64: 1, 8, 128>}, {transform_indices = @transform_2, window_bounds = array<i64: 3, 8, 8>}, {transform_indices = @transform_3, window_bounds = array<i64: 8, 1>}, {transform_indices = @transform_4, window_bounds = array<i64: 1, 8, 128>}]} {
    %c0 = arith.constant 0 : index
    %c0_0 = arith.constant 0 : index
    %c0_1 = arith.constant 0 : index
    %0 = vector.load %arg3[%c0, %c0_0, %c0_1] : memref<1x8x128xf32, #tpu.memory_space<vmem>>, vector<1x8x128xf32>
    %1 = vector.shape_cast %0 : vector<1x8x128xf32> to vector<8x128xf32>
    %c0_2 = arith.constant 0 : index
    %c0_3 = arith.constant 0 : index
    %c0_4 = arith.constant 0 : index
    %2 = vector.load %arg4[%c0_2, %c0_3, %c0_4] : memref<1x8x128xf32, #tpu.memory_space<vmem>>, vector<1x8x128xf32>
    %3 = vector.shape_cast %2 : vector<1x8x128xf32> to vector<8x128xf32>
    %4 = tpu.concatenate %1, %3 in 1 : vector<8x128xf32>, vector<8x128xf32> -> vector<8x256xf32>
    %5 = vector.extract_strided_slice %4 {offsets = [0, 0], sizes = [8, 128], strides = [1, 1]} : vector<8x256xf32> to vector<8x128xf32>
    %c0_5 = arith.constant 0 : index
    %c0_6 = arith.constant 0 : index
    %c0_7 = arith.constant 0 : index
    %6 = vector.load %arg5[%c0_5, %c0_6, %c0_7] : memref<3x8x8xf32, #tpu.memory_space<vmem>>, vector<1x8x8xf32>
    %7 = vector.shape_cast %6 : vector<1x8x8xf32> to vector<8x8xf32>
    %cst = arith.constant dense<0.000000e+00> : vector<8x128xf32>
    %8 = tpu.matmul %7, %5, %cst {dimension_numbers = #tpu.dot_dimension_numbers<[1], [0], [0], [1], [0, 0, 1, 1], [], []>} : vector<8x8xf32>, vector<8x128xf32>, vector<8x128xf32> -> vector<8x128xf32>
    %9 = vector.extract_strided_slice %4 {offsets = [0, 1], sizes = [8, 128], strides = [1, 1]} : vector<8x256xf32> to vector<8x128xf32>
    %c1 = arith.constant 1 : index
    %c0_8 = arith.constant 0 : index
    %c0_9 = arith.constant 0 : index
    %10 = vector.load %arg5[%c1, %c0_8, %c0_9] : memref<3x8x8xf32, #tpu.memory_space<vmem>>, vector<1x8x8xf32>
    %11 = vector.shape_cast %10 : vector<1x8x8xf32> to vector<8x8xf32>
    %cst_10 = arith.constant dense<0.000000e+00> : vector<8x128xf32>
    %12 = tpu.matmul %11, %9, %cst_10 {dimension_numbers = #tpu.dot_dimension_numbers<[1], [0], [0], [1], [0, 0, 1, 1], [], []>} : vector<8x8xf32>, vector<8x128xf32>, vector<8x128xf32> -> vector<8x128xf32>
    %13 = arith.addf %8, %12 : vector<8x128xf32>
    %14 = vector.extract_strided_slice %4 {offsets = [0, 2], sizes = [8, 128], strides = [1, 1]} : vector<8x256xf32> to vector<8x128xf32>
    %c2 = arith.constant 2 : index
    %c0_11 = arith.constant 0 : index
    %c0_12 = arith.constant 0 : index
    %15 = vector.load %arg5[%c2, %c0_11, %c0_12] : memref<3x8x8xf32, #tpu.memory_space<vmem>>, vector<1x8x8xf32>
    %16 = vector.shape_cast %15 : vector<1x8x8xf32> to vector<8x8xf32>
    %cst_13 = arith.constant dense<0.000000e+00> : vector<8x128xf32>
    %17 = tpu.matmul %16, %14, %cst_13 {dimension_numbers = #tpu.dot_dimension_numbers<[1], [0], [0], [1], [0, 0, 1, 1], [], []>} : vector<8x8xf32>, vector<8x128xf32>, vector<8x128xf32> -> vector<8x128xf32>
    %18 = arith.addf %13, %17 : vector<8x128xf32>
    %19 = vector.extract_strided_slice %4 {offsets = [0, 1], sizes = [8, 128], strides = [1, 1]} : vector<8x256xf32> to vector<8x128xf32>
    %c0_14 = arith.constant 0 : index
    %c0_15 = arith.constant 0 : index
    %20 = vector.load %arg6[%c0_14, %c0_15] : memref<8x1xf32, #tpu.memory_space<vmem>>, vector<8x1xf32>
    %21 = vector.broadcast %20 : vector<8x1xf32> to vector<8x128xf32>
    %22 = arith.addf %19, %21 : vector<8x128xf32>
    %23 = arith.addf %18, %22 : vector<8x128xf32>
    %c0_16 = arith.constant 0 : index
    %c0_17 = arith.constant 0 : index
    %c0_18 = arith.constant 0 : index
    %24 = vector.load %arg7[%c0_16, %c0_17, %c0_18] : memref<1x8x128xf32, #tpu.memory_space<vmem>>, vector<1x8x128xf32>
    %25 = vector.shape_cast %24 : vector<1x8x128xf32> to vector<8x128xf32>
    %26 = vector.shape_cast %23 : vector<8x128xf32> to vector<1x8x128xf32>
    tpu.vector_store %arg7[%c0_16, %c0_17, %c0_18], %26 {strides = array<i32>} : memref<1x8x128xf32, #tpu.memory_space<vmem>>, vector<1x8x128xf32>,
    return
  }
  func.func @transform_0(%arg0: i32, %arg1: i32, %arg2: i32) -> (i32, i32, i32) {
    %c0_i32 = arith.constant 0 : i32
    %c0_i32_0 = arith.constant 0 : i32
    return %arg0, %c0_i32, %arg2 : i32, i32, i32
  }
  func.func @transform_1(%arg0: i32, %arg1: i32, %arg2: i32) -> (i32, i32, i32) {
    %c1_i32 = arith.constant 1 : i32
    %0 = arith.addi %arg2, %c1_i32 : i32
    %c1_i32_0 = arith.constant 1 : i32
    %1 = arith.muli %0, %c1_i32_0 : i32
    %c0_i32 = arith.constant 0 : i32
    %c0_i32_1 = arith.constant 0 : i32
    return %arg0, %c0_i32, %1 : i32, i32, i32
  }
  func.func @transform_2(%arg0: i32, %arg1: i32, %arg2: i32) -> (i32, i32, i32) {
    %c0_i32 = arith.constant 0 : i32
    %c0_i32_0 = arith.constant 0 : i32
    %c0_i32_1 = arith.constant 0 : i32
    return %c0_i32, %arg1, %c0_i32_0 : i32, i32, i32
  }
  func.func @transform_3(%arg0: i32, %arg1: i32, %arg2: i32) -> (i32, i32) {
    %c0_i32 = arith.constant 0 : i32
    %c0_i32_0 = arith.constant 0 : i32
    return %arg1, %c0_i32 : i32, i32
  }
  func.func @transform_4(%arg0: i32, %arg1: i32, %arg2: i32) -> (i32, i32, i32) {
    %c0_i32 = arith.constant 0 : i32
    return %arg0, %arg1, %arg2 : i32, i32, i32
  }
}

</mosaic_0001>

<bundles_post_ra>
// kernel: tpu_custom_call.1
= control target key start
LH: loop header
LB: loop body
LE: loop exit
PB: predicated region body
PF: predicated region fallthrough
CT: control target
= control target key end

     0   :  { %s1279_s0 = inlined_call_operand.hbm [shape: f32[2,8,256], index: 0, kind: input, shape index: {}]   ;;  %s1280_s1 = inlined_call_operand.hbm [shape: f32[2,8,256], index: 1, kind: input, shape index: {}]   ;;  %s1281_s2 = inlined_call_operand.hbm [shape: f32[3,8,8], index: 2, kind: input, shape index: {}]   ;;  %s1282_s3 = inlined_call_operand.vmem [shape: f32[8,1], index: 3, kind: input, shape index: {}]   ;;  %s1283_s4 = inlined_call_operand.hbm [shape: f32[2,8,128], index: 4, kind: output, shape index: {}]  }
   0x1   :  { %1285 = sst [smem:[#allocation14_spill]] %s1279_s0 }
   0x2   :  { %1286 = sst [smem:[#allocation15_spill]] %s1281_s2 }
   0x3   :  { %9 = vsyncpa [#allocation3], 0 }
   0x4   :  { %11 = vsyncpa [#allocation3 + $0x1], 0 }
   0x5   :  { %12 = vsyncpa [#allocation6], 0 }
   0x6   :  { %14 = vsyncpa [#allocation6 + $0x1], 0 }
   0x7   :  { %15 = vsyncpa [#allocation4], 0 }
   0x8   :  { %17 = vsyncpa [#allocation4 + $0x1], 0  ;;  %s1080_s15 = smov 0   ;;  %s1082_s16 = smov 0  }
   0x9   :  { %s1084_s17 = smov 0   ;;  %s1086_s18 = smov 0  }
   0xa   :  { %s1088_s19 = smov 0   ;;  %s1090_s20 = smov 0  }
   0xb LB: > { %s1111_s21 = sadd.s32 4294967295, %s1042_s20   ;;  %s739_s22 = sadd.s32 4294967294, %s1042_s20   ;;  %s1042_s20 = sphi %s1090_s20, %s23_s20   ;;  %s1038_s19 = sphi %s1088_s19, %s1305_s19   ;;  %s1034_s18 = sphi %s1086_s18, %s1304_s18   ;;  %s1030_s17 = sphi %s1084_s17, %s1303_s17   ;;  %s1026_s16 = sphi %s1082_s16, %s1302_s16   ;;  %s1022_s15 = sphi %s1080_s15, %s1301_s15  }
   0xc   : > { %p64_p0 = scmp.ne.s32.totalorder %s1026_s16, %s1022_s15  ;;  %p65_p1 = scmp.eq.s32.totalorder %s1111_s21, 0 }
   0xd   : > { %p180_p3 = scmp.eq.s32.totalorder %s739_s22, 1  ;;  %p740_p5 = scmp.ge.s32.totalorder %s1042_s20, 1 }
   0xe   : > { %p1120_p4 = por %p65_p1, %p64_p0  ;;  %p187_p7 = scmp.lt.s32.totalorder %s1042_s20, 3 }
   0xf   : > { %p1125_p6 = por %p180_p3, %p64_p0  ;;  %s1044_s26 = smov [#allocation7]  }
  0x10   : > { %p1130_p8 = pnand %p740_p5, %p187_p7  ;;  %s201_s27 = sshll.u32 %s1044_s26, 4  ;;  %s202_s27 = int_to_ptr.vmem [resolvable:$true] %s201_s27 }
  0x11   : > { %s1288_s24 = scalar_select %p1125_p6, 1, 0 }
  0x12   : > { %p795_p9 = pneg %p1130_p8  ;;  %s42_s29 = sadd.s32 1, %s1038_s19 }
  0x13   : > { %s882_s30 = scalar_lea.vmem %s202_s27, 384  ;;  %p890_p5 = scmp.lt.s32.totalorder %s202_s27, %s202_s27 }
  0x14   : > { %p1139_p11 = pnand %p795_p9, %p65_p1  ;;  %p883_p13 = scmp.ne.s32.totalorder %s202_s27, %s882_s30 }
  0x15   : > { %p891_p7 = scmp.lt.s32.totalorder %s882_s30, %s882_s30 }
  0x16   : > { %p873_p12 = pneg %p1139_p11 }
  0x17   : > { %p892_p2 = por %p891_p7, %p890_p5 }
  0x18   : > { %p885_p0 = pnand %p883_p13, %p873_p12 }
  0x1a   : > { %p886_p3 = pneg %p885_p0 }
  0x1c   : > { %p893_p6 = pnand %p892_p2, %p886_p3 }
  0x1e   : > { %896 = shalt.err (!%p893_p6)
}
  0x1f   : > { %s1045_s5 = smov 128   ;;  %s1046_s6 = smov 8  }
  0x20   : > { %s1291_s2 = sld [smem:[#allocation15_spill]]  ;;  %p44_p2 = scmp.ge.s32.totalorder %s42_s29, 2 }
  0x21   : > { %s51_s9 = sadd.s32 1, %s1030_s17  ;;  %p58_p6 = scmp.ne.s32.totalorder %s1030_s17, %s1026_s16 }
  0x22   : > { %p59_p9 = scmp.eq.s32.totalorder %s1042_s20, 0  ;;  %s1307_s29 = smov (%p44_p2, %s42_s29), 0 }
  0x23   : > { %1292 = sst [smem:[#allocation13_spill]] %s1307_s29  ;;  %p1294_p13 = scmp.eq.s32.totalorder %s1111_s21, 1 }
  0x24   : > { %p1157_p12 = por %p59_p9, %p58_p6  ;;  %s46_s12 = ssub.s32 %s1038_s19, %s1307_s29 }
  0x25   : > { %p1163_p0 = por %p1294_p13, %p58_p6  ;;  %p49_p3 = scmp.eq.s32.totalorder %s46_s12, 0 }
  0x26   : > { %798 = dma.hbm_to_vmem [thread:$0]  (!%p1139_p11), %s1291_s2, 384, %s202_s27, [#allocation6], %s1045_s5, %s1045_s5, %s1046_s6  }
  0x27   : > { %p811_p11 = scmp.lt.s32.totalorder %s1042_s20, 2  ;;  %s222_s13 = sand.u32 1, %s1030_s17  }
  0x28   : > { %s744_s14 = sshll.u32 %s222_s13, 3  ;;  %s762_s26 = sshll.u32 %s1038_s19, 8 }
  0x29   : > { %s1172_s22 = scalar_select %p49_p3, %s1030_s17, %s51_s9  }
  0x2a   : > { %s1296_s0 = sld [smem:[#allocation14_spill]]  ;;  %s226_s5 = scalar_lea.vmem [#allocation2], %s744_s14 }
  0x2b   : > { %s235_s6 = sshll.u32 %s226_s5, 4  ;;  %p1180_p5 = pnand %p811_p11, %p1157_p12  ;;  %s236_s6 = int_to_ptr.vmem [resolvable:$true] %s235_s6 }
  0x2c   : > { %s1187_s9 = scalar_lea.hbm %s1280_s1, %s762_s26  ;;  %s242_s12 = sand.u32 1, %s1042_s20  }
  0x2d   : > { %s223_s29 = scalar_lea.sflag [#allocation3], %s222_s13  ;;  %p899_p7 = pneg %p1180_p5 }
  0x2e   : > { %s910_s27 = scalar_lea.vmem %s236_s6, 128  ;;  %s1047_s10 = smov [#allocation2]  }
  0x2f   : > { %p911_p2 = scmp.ne.s32.totalorder %s236_s6, %s910_s27  ;;  %s915_s28 = sshll.u32 %s1047_s10, 4  ;;  %s916_s28 = int_to_ptr.vmem [resolvable:$false] %s915_s28 }
  0x30   : > { %s233_s30 = scalar_lea.hbm %s1296_s0, %s762_s26  ;;  %s917_s5 = scalar_lea.vmem %s916_s28, 256 }
  0x31   : > { %p913_p6 = pnand %p911_p2, %p899_p7  ;;  %p918_p12 = scmp.lt.s32.totalorder %s236_s6, %s916_s28 }
  0x32   : > { %p919_p13 = scmp.lt.s32.totalorder %s917_s5, %s910_s27 }
  0x33   : > { %p914_p9 = pneg %p913_p6 }
  0x34   : > { %p920_p11 = por %p919_p13, %p918_p12 }
  0x36   : > { %p921_p3 = pnand %p920_p11, %p914_p9 }
  0x38   : > { %924 = shalt.err (!%p921_p3)
}
  0x39   : > { %802 = dma.hbm_to_vmem [thread:$0]  (!%p1180_p5), %s233_s30, 128, %s236_s6, %s223_s29  }
  0x3a   : > { %s646_s2 = scalar_lea.hbm %s1187_s9, 128  ;;  %s246_s13 = scalar_lea.vmem [#allocation5], %s744_s14 }
  0x3b   : > { %s256_s26 = sshll.u32 %s246_s13, 4  ;;  %s243_s8 = scalar_lea.sflag [#allocation6], %s242_s12  ;;  %s257_s26 = int_to_ptr.vmem [resolvable:$true] %s256_s26 }
  0x3c   : > { %s938_s0 = scalar_lea.vmem %s257_s26, 128  ;;  %s1048_s27 = smov [#allocation5]  }
  0x3d   : > { %p939_p2 = scmp.ne.s32.totalorder %s257_s26, %s938_s0  ;;  %s943_s10 = sshll.u32 %s1048_s27, 4  ;;  %s944_s10 = int_to_ptr.vmem [resolvable:$false] %s943_s10 }
  0x3e   : > { %s945_s28 = scalar_lea.vmem %s944_s10, 256  ;;  %p946_p9 = scmp.lt.s32.totalorder %s257_s26, %s944_s10 }
  0x3f   : > { %p941_p6 = pnand %p939_p2, %p899_p7  ;;  %p947_p12 = scmp.lt.s32.totalorder %s945_s28, %s938_s0 }
  0x41   : > { %p942_p10 = pneg %p941_p6  ;;  %p948_p13 = por %p947_p12, %p946_p9 }
  0x43   : > { %p949_p11 = pnand %p948_p13, %p942_p10 }
  0x45   : > { %952 = shalt.err (!%p949_p11)
}
  0x46   : > { %805 = dma.hbm_to_vmem [thread:$0]  (!%p1180_p5), %s646_s2, 128, %s257_s26, %s243_s8  }
  0x47   : > { %265 = sbr.rel (%p1130_p8) target bundleno = 421 (0x1a5), region = 36  ;;  %s1206_s29 = sand.u32 (!%p1130_p8), 1, %s1026_s16  }
  0x48   : > { %s1209_s14 = sshll.u32 (!%p1130_p8), %s1206_s29, 3  ;;  %s268_s30 = scalar_lea.sflag (!%p1130_p8), [#allocation3], %s1206_s29 }
  0x49   : > { %s271_s0 = scalar_lea.vmem (!%p1130_p8), [#allocation2], %s1209_s14 }
  0x4c   : > { %1005 = dma.done.wait (%p1120_p4), %s268_s30, 128  }
  0x4d   : > { %1007 = vsyncadd (%p1120_p4), %s268_s30, 4294967168  ;;  %s276_s25 = sand.u32 1, %s1111_s21   ;;  %s280_s7 = scalar_lea.vmem [#allocation5], %s1209_s14 }
  0x4e   : > { %s277_s6 = scalar_lea.sflag [#allocation6], %s276_s25 }
  0x4f   : > { %1009 = dma.done.wait (%p1120_p4), %s277_s6, 128  }
  0x50   : > { %1011 = vsyncadd (%p1120_p4), %s277_s6, 4294967168 }
  0x51   : > { %1013 = dma.done.wait (%p65_p1), [#allocation6], 384  }
  0x52   : > { %1015 = vsyncadd (%p65_p1), [#allocation6], 4294966912  ;;  %v1049_v0 = vmov 0   ;;  %v1050_v1 = vmov 0.0   ;;  %vm1051_vm0 = vmmov 0   ;;  %v323_v2 = vld [vmem:[%s271_s0] sm:$0xff] }
  0x53   : > { %870 = vset.pattern.permute.xlu0 %v1049_v0  ;;  %770 = vmatprep.subr.mxu0 %v1050_v1  ;;  %vm337_vm1 = vcmask 64512   ;;  %s1052_s23 = smov 126   ;;  %s1053_s9 = smov 127   ;;  %v325_v3 = vld [vmem:[#allocation7] sm:$0xff]  ;;  %v324_v4 = vld [vmem:[%s280_s7] sm:$0xff]  ;;  %vm334_vm2 = vcmask 1039360  }
  0x54   : > { %772 = vmatprep.mubr.msk.f32.mxu0 %vm1051_vm0, %v1050_v1  ;;  %775 = vmatprep.subr.mxu1 %v1050_v1  ;;  %v567_v5 = vld [vmem:[%s1282_s3] sm:$0xff]  ;;  %vm490_vm3 = vcmask 1031168   ;;  %v327_v10 = vld [vmem:[#allocation7 + $0x8] sm:$0xff]  ;;  %v485_v13 = vld [vmem:[#allocation7 + $0x10] sm:$0xff]  ;;  %s759_s5 = sshll.u32 %s1034_s18, 7  ;;  %s317_s2 = scalar_lea.vmem [#allocation8], %s1209_s14 }
  0x55   : > { %777 = vmatprep.mubr.msk.f32.mxu1 %vm1051_vm0, %v1050_v1  ;;  %486 = vrot.lane.b32.xlu1 %v323_v2, %s1052_s23  ;;  %s601_s13 = sshll.u32 %s317_s2, 4  ;;  %s599_s27 = scalar_lea.hbm %s1283_s4, %s759_s5  ;;  %s602_s13 = int_to_ptr.vmem [resolvable:$true] %s601_s13 }
  0x56   : > { %330 = vrot.lane.b32.xlu0 %v323_v2, %s1053_s9  ;;  %776 = vmatpush3.msra.mxu1 %v323_v2  ;;  %s586_s10 = scalar_lea.sflag [#allocation4], %s1206_s29  ;;  %s954_s28 = scalar_lea.vmem %s602_s13, 128 }
  0x57   : > { %778 = vmatmul.mubr.msk.f32.vlgmr.msra.gmra.mxu1 %vm337_vm1, %v325_v3  ;;  %p955_p1 = scmp.ne.s32.totalorder %s602_s13, %s954_s28  ;;  %s1054_s18 = smov [#allocation8]  }
  0x58   : > { %s958_s14 = sshll.u32 %s1054_s18, 4  ;;  %s959_s14 = int_to_ptr.vmem [resolvable:$false] %s958_s14 }
  0x59   : > { %488 = vrot.lane.b32.xlu1 %v324_v4, %s1052_s23  ;;  %p956_p4 = pnand %p955_p1, %p1163_p0  ;;  %s960_s30 = scalar_lea.vmem %s959_s14, 256 }
  0x5a   : > { %332 = vrot.lane.b32.xlu0 %v324_v4, %s1053_s9  ;;  %p961_p10 = scmp.lt.s32.totalorder %s602_s13, %s959_s14  ;;  %p962_p5 = scmp.lt.s32.totalorder %s960_s30, %s954_s28 }
  0x5b   : > { %p957_p8 = pneg %p956_p4 }
  0x5c   : > { %p963_p7 = por %p962_p5, %p961_p10 }
  0x5e   : > { %570 = vperm.xlu0 %870, %v567_v5   ;;  %p964_p3 = pnand %p963_p7, %p957_p8 }
  0xc7   : > { %v487_v6 = vpop.permute.xlu1 %486 }
  0xc8   : > { %v331_v7 = vpop.permute.xlu0 %330 }
  0xcb   : > { %v489_v8 = vpop.permute.xlu1 %488 }
  0xcc   : > { %v333_v9 = vpop.permute.xlu0 %332  ;;  %v491_v12 = vsel %vm490_vm3, %v487_v6, %v489_v8 }
  0xcd   : > { %v335_v11 = vsel %vm334_vm2, %v331_v7, %v333_v9 }
  0xce   : > { %771 = vmatpush3.msra.mxu0 %v335_v11 }
  0xcf   : > { %773 = vmatmul.mubr.msk.f32.vlgmr.msra.gmra.mxu0 %vm337_vm1, %v327_v10  ;;  %780 = vmatprep.subr.mxu0 %v1050_v1 }
  0xd0   : > { %781 = vmatpush3.msra.mxu0 %v491_v12  ;;  %782 = vmatprep.mubr.msk.f32.mxu0 %vm1051_vm0, %v1050_v1 }
  0xd3   : > { %783 = vmatmul.mubr.msk.f32.vlgmr.msra.gmra.mxu0 %vm337_vm1, %v485_v13 }
  0xd9   : > { %v571_v14 = vpop.permute.xlu0 %570 }
  0xda   : > { %v573_v15 = vadd.f32 %v571_v14, %v323_v2  ;;  %v574_v16 = vadd.f32 %v571_v14, %v324_v4 }
  0xdc   : > { %577 = vrot.lane.b32.xlu1 %v573_v15, %s1053_s9 }
  0xe0   : > { %579 = vrot.lane.b32.xlu1 %v574_v16, %s1053_s9 }
 0x117   : > { %v480_v17 = vpop.f32.mrf.mxu1 }
 0x119   : > { %v779_v18 = vpop.f32.mrf.mxu1 }
 0x14e   : > { %v578_v19 = vpop.permute.xlu1 %577 }
 0x152   : > { %v580_v23 = vpop.permute.xlu1 %579 }
 0x153   : > { %v581_v26 = vsel %vm334_vm2, %v578_v19, %v580_v23 }
 0x18f   : > { %v407_v20 = vpop.f32.mrf.mxu0 }
 0x190   : > { %v481_v22 = vadd.f32 %v480_v17, %v407_v20 }
 0x191   : > { %v774_v21 = vpop.f32.mrf.mxu0 }
 0x193   : > { %v562_v24 = vpop.f32.mrf.mxu0 }
 0x194   : > { %v566_v25 = vadd.f32 %v562_v24, %v481_v22 }
 0x195   : > { %v784_v27 = vpop.f32.mrf.mxu0 }
 0x196   : > { %v583_v28 = vadd.f32 %v581_v26, %v566_v25 }
 0x198   : > { %584 = vst [vmem:[%s317_s2] sm:$0xff] %v583_v28 }
 0x199   : > { %967 = shalt.err (!%p964_p3)
}
 0x19a   : > { %s968_s0 = scalar_lea.hbm %s599_s27, 128  ;;  %s972_s6 = scalar_lea.hbm %s1283_s4, 256 }
 0x19b   : > { %p969_p2 = scmp.ne.s32.totalorder %s599_s27, %s968_s0  ;;  %p973_p12 = scmp.lt.s32.totalorder %s599_s27, %s1283_s4 }
 0x19c   : > { %p974_p13 = scmp.lt.s32.totalorder %s972_s6, %s968_s0 }
 0x19d   : > { %p970_p6 = pnand %p969_p2, %p1163_p0 }
 0x19e   : > { %p975_p11 = por %p974_p13, %p973_p12 }
 0x19f   : > { %p971_p9 = pneg %p970_p6 }
 0x1a1   : > { %p976_p1 = pnand %p975_p11, %p971_p9 }
 0x1a3   : > { %979 = shalt.err (!%p976_p1)
}
 0x1a4   : > { %793 = dma.vmem_to_hbm [thread:$0]  (%p1163_p0), %s602_s13, 128, %s599_s27, %s586_s10  }
 0x1a5 PF: > { %s613_s9 = sand.u32 1, %s1022_s15   ;;  %p1298_p4 = scmp.ne.s32.totalorder %s1288_s24, 0 }
 0x1a6   : > { %p1299_p8 = scmp.ge.s32.totalorder %s1042_s20, 2  ;;  %s614_s21 = scalar_lea.sflag [#allocation4], %s613_s9 }
 0x1a8   : > { %p807_p10 = pnand %p1299_p8, %p1298_p4 }
 0x1aa   : > { %p808_p5 = pneg %p807_p10 }
 0x1ac   : > { %1017 = dma.done.wait (%p808_p5), %s614_s21, 128  }
 0x1ad   : > { %1019 = vsyncadd (%p808_p5), %s614_s21, 4294967168  ;;  %s23_s20 = sadd.s32 1, %s1042_s20   ;;  %s1300_s11 = sld [smem:[#allocation13_spill]] }
 0x1ae   : > { %p20_p7 = scmp.ge.s32.totalorder %s23_s20, 4   ;;  %s1301_s15 = smov %s1026_s16 }
 0x1af   : > { %s1302_s16 = smov %s1030_s17  ;;  %s1303_s17 = smov %s1172_s22 }
 0x1b0   : > { %s1304_s18 = smov %s1038_s19  ;;  %22 = sbr.rel (!%p20_p7) target bundleno = 11 (0xb), region = 104 }
 0x1b3   : > { %s1305_s19 = smov %s1300_s11 }
 0x1b5   :  { %619 = vsyncpa [#allocation3], 1 }
 0x1b6   :  { %621 = vsyncpa [#allocation3 + $0x1], 1 }
 0x1b7   :  { %622 = vsyncpa [#allocation6], 1 }
 0x1b8   :  { %624 = vsyncpa [#allocation6 + $0x1], 1 }
 0x1b9   :  { %625 = vsyncpa [#allocation4], 1 }
 0x1ba   :  { %627 = vsyncpa [#allocation4 + $0x1], 1 }

</bundles_post_ra>
